<compile_context>
chip_gen: v7x
topology: tpu7x:2x2x1
jax: 0.10.0
libtpu: 0.0.40
codegen_flags: <defaults>
</compile_context>

<pallas_src>
import functools
import math

import numpy as np
import jax
import jax.numpy as jnp
from jax.experimental import pallas as pl
from jax.experimental.pallas import tpu as pltpu

BN_EPS = 1e-5
MXU_DTYPE = jnp.bfloat16     # matmul operand dtype (accumulation stays f32)

_PARITIES = ((0, 0), (0, 1), (1, 0), (1, 1))
# (parity bit, input offset d) -> transposed-conv kernel index k (None = no tap)
# for ConvTranspose2d(kernel=3, stride=2, padding=1, output_padding=1)
_TD_KMAP = {(0, 0): 1, (0, 1): None, (1, 0): 2, (1, 1): 0}


# ---------------------------------------------------------------------------
# Pallas kernel: several fused convs (conv + BN [+ReLU] [+residual]) per call
# ---------------------------------------------------------------------------
def _fused_conv_multi_kernel(*refs, metas):
    """refs = per-job [x, g, scale, shift, (res)] ... then one output per job.

    x:     [B, Hp, W_in*Cin]   (H pre-padded, W/boundary handling baked into g)
    g:     [NG, KH, W_in*Cin, W_out*Cout]  banded conv matrices (bf16)
    scale: [1, W_out*Cout]  folded-BN scale (f32)
    shift: [1, W_out*Cout]  folded-BN shift (f32)
    res:   [NG, B, Hout, W_out*Cout]  optional residual (added after ReLU)
    out:   [NG, B, Hout, W_out*Cout]
    """
    n_in = sum(5 if m["has_res"] else 4 for m in metas)
    in_refs, out_refs = refs[:n_in], refs[n_in:]
    pos = 0
    for j, m in enumerate(metas):
        x_ref, g_ref, scale_ref, shift_ref = in_refs[pos:pos + 4]
        pos += 4
        res_ref = None
        if m["has_res"]:
            res_ref = in_refs[pos]
            pos += 1
        o_ref = out_refs[j]

        scale = scale_ref[...]
        shift = shift_ref[...]
        h_out = m["h_out"]
        h_stride = m["h_stride"]
        for p in range(m["n_groups"]):          # static unroll (<=4)
            for b in range(m["batch"]):         # static unroll (small batch)
                acc = None
                for di in range(m["kh"]):       # static unroll (<=3 H-taps)
                    if h_stride == 1 or h_out == 1:
                        lhs = x_ref[b, di:di + h_out, :]
                    else:
                        # strided H-tap rows (not exercised in the demo config)
                        lhs = x_ref[b, pl.ds(di, h_out, stride=h_stride), :]
                    part = jnp.dot(lhs.astype(MXU_DTYPE),
                                   g_ref[p, di, :, :],
                                   preferred_element_type=jnp.float32)
                    acc = part if acc is None else acc + part
                y = acc * scale + shift
                if m["relu"]:
                    y = jnp.maximum(y, 0.0)
                if m["has_res"]:
                    y = y + res_ref[p, b, :, :].astype(jnp.float32)
                o_ref[p, b, :, :] = y.astype(o_ref.dtype)


def fused_conv_multi(jobs):
    """Run several fused convs in ONE pallas_call.

    Each job: dict(x=[B,Hp,Din] f32, g=[NG,KH,Din,Dout] bf16, scale=[1,Dout],
                   shift=[1,Dout], h_out=int, h_stride=int, relu=bool,
                   res=[NG,B,Hout,Dout] or absent).
    Returns list of [NG, B, Hout, Dout] f32 arrays.
    """
    args, metas, out_shapes = [], [], []
    for job in jobs:
        x, g = job["x"], job["g"]
        has_res = job.get("res") is not None
        metas.append(dict(n_groups=int(g.shape[0]), kh=int(g.shape[1]),
                          batch=int(x.shape[0]), h_out=int(job["h_out"]),
                          h_stride=int(job["h_stride"]), relu=bool(job["relu"]),
                          has_res=has_res))
        args += [x, g, job["scale"], job["shift"]]
        if has_res:
            args.append(job["res"])
        out_shapes.append(jax.ShapeDtypeStruct(
            (g.shape[0], x.shape[0], job["h_out"], g.shape[-1]), jnp.float32))

    kernel = functools.partial(_fused_conv_multi_kernel, metas=tuple(metas))
    vmem = pl.BlockSpec(memory_space=pltpu.MemorySpace.VMEM)
    outs = pl.pallas_call(
        kernel,
        out_shape=tuple(out_shapes),
        in_specs=[vmem] * len(args),
        out_specs=tuple([vmem] * len(out_shapes)),
    )(*args)
    return list(outs)


# ---------------------------------------------------------------------------
# Layout helpers (pure XLA glue on small arrays)
# ---------------------------------------------------------------------------
def nchw_to_rows(x):
    b, c, h, w = x.shape
    return jnp.transpose(x, (0, 2, 3, 1)).reshape(b, h, w * c)


def rows_to_nchw(rows, w, c):
    b, h, _ = rows.shape
    return jnp.transpose(rows.reshape(b, h, w, c), (0, 3, 1, 2))


def pad_rows_h(rows, pad_top, pad_bot):
    if pad_top == 0 and pad_bot == 0:
        return rows
    return jnp.pad(rows, ((0, 0), (pad_top, pad_bot), (0, 0)))


# ---------------------------------------------------------------------------
# Precomputed banded conv matrices (built once, host-side)
# ---------------------------------------------------------------------------
def _build_banded_g(tap_w, w_in, w_out, c_in, c_out, stride, pad_w):
    """tap_w: np [KH, KW, Cin, Cout] -> banded G: [KH, W_in*Cin, W_out*Cout].

    G[di, src*Cin + c, w*Cout + n] = tap_w[di, dj, c, n]  with
    src = w*stride + dj - pad_w  (out-of-range taps stay zero -> W boundary).
    """
    kh, kw = tap_w.shape[:2]
    g = np.zeros((kh, w_in * c_in, w_out * c_out), np.float32)
    for di in range(kh):
        for dj in range(kw):
            blk = tap_w[di, dj]
            for w in range(w_out):
                src = w * stride + dj - pad_w
                if 0 <= src < w_in:
                    g[di, src * c_in:(src + 1) * c_in,
                      w * c_out:(w + 1) * c_out] = blk
    return g


def _make_conv_desc(weight, bn_scale, bn_shift, *, h_in, w_in, k, stride, pad,
                    relu):
    """Ordinary conv: weight [Cout, Cin, k, k] (torch layout)."""
    c_out, c_in = int(weight.shape[0]), int(weight.shape[1])
    h_out = (h_in + 2 * pad - k) // stride + 1
    w_out = (w_in + 2 * pad - k) // stride + 1
    tap_w = np.transpose(np.asarray(weight), (2, 3, 1, 0))   # [k, k, Cin, Cout]
    g = _build_banded_g(tap_w, w_in, w_out, c_in, c_out, stride, pad)
    pad_top = pad
    pad_bot = max(0, (h_out - 1) * stride + k - 1 - pad - (h_in - 1))
    return dict(
        g=jnp.asarray(g[None], MXU_DTYPE),                   # [1, k, Din, Dout]
        scale=jnp.tile(bn_scale, w_out).reshape(1, w_out * c_out),
        shift=jnp.tile(bn_shift, w_out).reshape(1, w_out * c_out),
        h_out=h_out, h_stride=stride, h_pad=(pad_top, pad_bot),
        relu=relu, w_out=w_out, c_out=c_out)


def _make_td_desc(weight, bn_scale, bn_shift, *, h_in, w_in):
    """Top-down transposed conv (dense analogue of SparseInverseConv).

    weight: [Cin, Cout, 3, 3] (torch ConvTranspose layout).  Sub-pixel
    decomposition of ConvTranspose2d(k=3, s=2, p=1, output_padding=1):
    4 parity phases, each a 2x2-tap conv on the bottom/right zero-extended
    input (no zero-dilated input, no wasted MXU work).
    """
    c_in, c_out = int(weight.shape[0]), int(weight.shape[1])
    w_np = np.asarray(weight)
    gs = []
    for (py, px) in _PARITIES:
        tap_w = np.zeros((2, 2, c_in, c_out), np.float32)
        for dh in range(2):
            ki = _TD_KMAP[(py, dh)]
            if ki is None:
                continue
            for dw in range(2):
                kj = _TD_KMAP[(px, dw)]
                if kj is None:
                    continue
                tap_w[dh, dw] = w_np[:, :, ki, kj]            # already [Cin,Cout]
        gs.append(_build_banded_g(tap_w, w_in, w_in, c_in, c_out, 1, 0))
    g = np.stack(gs)                                          # [4, 2, Din, Dout]
    return dict(
        g=jnp.asarray(g, MXU_DTYPE),
        scale=jnp.tile(bn_scale, w_in).reshape(1, w_in * c_out),
        shift=jnp.tile(bn_shift, w_in).reshape(1, w_in * c_out),
        h_out=h_in, h_stride=1, h_pad=(0, 1),
        relu=True, w_out=w_in, c_out=c_out)


# ---------------------------------------------------------------------------
# Deterministic parameter construction (mirrors FPN.__init__ channel logic)
# ---------------------------------------------------------------------------
def _xavier_uniform(key, shape, fan_in, fan_out):
    limit = math.sqrt(6.0 / (fan_in + fan_out))
    return jax.random.uniform(key, shape, jnp.float32, -limit, limit)


def _bn_params(key, c):
    k1, k2, k3, k4 = jax.random.split(key, 4)
    gamma = jax.random.uniform(k1, (c,), jnp.float32, 0.8, 1.2)
    beta = jax.random.uniform(k2, (c,), jnp.float32, -0.1, 0.1)
    mean = jax.random.uniform(k3, (c,), jnp.float32, -0.1, 0.1)
    var = jax.random.uniform(k4, (c,), jnp.float32, 0.9, 1.1)
    scale = gamma / jnp.sqrt(var + BN_EPS)
    shift = beta - mean * scale
    return scale, shift


def make_fpn_params(key, in_channels, out_channels, fpn_lvls, extra_fpn_lvl,
                    spatials):
    lvl0 = fpn_lvls[0]
    lat, td, fpn = [], [], []
    for idx, cin in enumerate(in_channels):
        cout = out_channels // 2 ** (lvl0 - idx) if idx < lvl0 else out_channels
        s = spatials[idx]
        key, kw, kb = jax.random.split(key, 3)
        w = _xavier_uniform(kw, (cout, cin, 1, 1), cin, cout)       # 1x1 lateral
        scale, shift = _bn_params(kb, cout)
        lat.append(_make_conv_desc(w, scale, shift, h_in=s, w_in=s, k=1,
                                   stride=1, pad=0, relu=False))
        if idx > 0:
            td_in = out_channels // 2 ** (lvl0 - idx) if idx < lvl0 else out_channels
            td_out = (out_channels // 2 ** (lvl0 - idx + 1)
                      if idx < lvl0 + 1 else out_channels)
            key, kw, kb = jax.random.split(key, 3)
            wt = _xavier_uniform(kw, (td_in, td_out, 3, 3), td_in * 9, td_out * 9)
            tscale, tshift = _bn_params(kb, td_out)
            td.append(_make_td_desc(wt, tscale, tshift, h_in=s, w_in=s))
        if idx in fpn_lvls:
            key, kw, kb = jax.random.split(key, 3)
            wf = _xavier_uniform(kw, (cout, cout, 3, 3), cout * 9, cout * 9)
            fscale, fshift = _bn_params(kb, cout)
            fpn.append(_make_conv_desc(wf, fscale, fshift, h_in=s, w_in=s, k=3,
                                       stride=1, pad=1, relu=False))
    if extra_fpn_lvl:
        s = spatials[-1]
        key, kw, kb = jax.random.split(key, 3)
        we = _xavier_uniform(kw, (out_channels, out_channels, 3, 3),
                             out_channels * 9, out_channels * 9)
        escale, eshift = _bn_params(kb, out_channels)
        fpn.append(_make_conv_desc(we, escale, eshift, h_in=s, w_in=s, k=3,
                                   stride=2, pad=1, relu=False))
    return dict(lateral=lat, td=td, fpn=fpn)


# ---------------------------------------------------------------------------
# FPN forward (mirrors the PyTorch FPN.forward)
# ---------------------------------------------------------------------------
def fpn_forward(inputs_nchw, params, fpn_lvls, semantic_lvl, extra_fpn_lvl):
    lat_descs = params["lateral"]
    assert len(inputs_nchw) == len(lat_descs)

    # lateral 1x1 convs (act=None): all levels fused into ONE pallas_call
    jobs = []
    for x, d in zip(inputs_nchw, lat_descs):
        rows = pad_rows_h(nchw_to_rows(x), *d["h_pad"])
        jobs.append(dict(x=rows, g=d["g"], scale=d["scale"], shift=d["shift"],
                         h_out=d["h_out"], h_stride=d["h_stride"],
                         relu=d["relu"]))
    laterals = [o[0] for o in fused_conv_multi(jobs)]        # [B, H, W*C] rows

    # top-down path: sub-pixel transposed conv + BN + ReLU + residual add,
    # all fused in one pallas_call per level (4 parity phases batched).
    num_tds = len(params["td"])
    for i in reversed(range(num_tds)):
        d = params["td"][i]                                   # acts on laterals[i+1]
        x_rows = pad_rows_h(laterals[i + 1], *d["h_pad"])
        b = x_rows.shape[0]
        h_lo, w_lo, c = d["h_out"], d["w_out"], d["c_out"]
        lat_hi = laterals[i].reshape(b, 2 * h_lo, 2 * w_lo, c)
        res = jnp.stack([lat_hi[:, py::2, px::2, :].reshape(b, h_lo, w_lo * c)
                         for (py, px) in _PARITIES])          # [4, B, h_lo, w_lo*c]
        (out,) = fused_conv_multi([dict(x=x_rows, g=d["g"], scale=d["scale"],
                                        shift=d["shift"], res=res,
                                        h_out=h_lo, h_stride=1, relu=True)])
        # interleave the 4 parity phases back to full resolution rows
        out = out.reshape(2, 2, b, h_lo, w_lo, c)
        out = jnp.transpose(out, (2, 3, 0, 4, 1, 5))          # [B, h, py, w, px, c]
        laterals[i] = out.reshape(b, 2 * h_lo, 2 * w_lo * c)

    sem_d = lat_descs[semantic_lvl]
    semantic_feats = rows_to_nchw(laterals[semantic_lvl],
                                  sem_d["w_out"], sem_d["c_out"])

    # per-level fpn 3x3 convs (+ extra stride-2 level): ONE pallas_call
    jobs, shapes = [], []
    for k, lvl in enumerate(fpn_lvls):
        d = params["fpn"][k]
        rows = pad_rows_h(laterals[lvl], *d["h_pad"])
        jobs.append(dict(x=rows, g=d["g"], scale=d["scale"], shift=d["shift"],
                         h_out=d["h_out"], h_stride=d["h_stride"],
                         relu=d["relu"]))
        shapes.append((d["w_out"], d["c_out"]))
    if extra_fpn_lvl:
        d = params["fpn"][-1]
        rows = pad_rows_h(laterals[-1], *d["h_pad"])
        jobs.append(dict(x=rows, g=d["g"], scale=d["scale"], shift=d["shift"],
                         h_out=d["h_out"], h_stride=d["h_stride"],
                         relu=d["relu"]))
        shapes.append((d["w_out"], d["c_out"]))
    fpn_outs = fused_conv_multi(jobs)
    fpn_feats = [rows_to_nchw(o[0], w, c)
                 for o, (w, c) in zip(fpn_outs, shapes)]
    return semantic_feats, fpn_feats


# ---------------------------------------------------------------------------
if __name__ == "__main__":
    # Small config consistent with the module's channel logic:
    #   4 pyramid levels, fpn_lvls = range(2, 4), extra stride-2 level.
    in_channels = (8, 16, 32, 32)
    out_channels = 32
    fpn_lvls = list(range(2, 4))
    semantic_lvl = 0
    extra_fpn_lvl = True

    batch = 2
    base_spatial = 16  # level i has spatial base_spatial // 2**i
    spatials = [base_spatial // (2 ** i) for i in range(len(in_channels))]

    key = jax.random.PRNGKey(0)
    key, pkey = jax.random.split(key)
    params = make_fpn_params(pkey, in_channels, out_channels, fpn_lvls,
                             extra_fpn_lvl, spatials)

    inputs = []
    for i, cin in enumerate(in_channels):
        key, ik = jax.random.split(key)
        s = spatials[i]
        inputs.append(jax.random.normal(ik, (batch, cin, s, s), jnp.float32))

    semantic_feats, fpn_feats = fpn_forward(inputs, params, fpn_lvls,
                                            semantic_lvl, extra_fpn_lvl)

    jax.block_until_ready(semantic_feats)
    for f in fpn_feats:
        jax.block_until_ready(f)

    # sanity on shapes
    assert semantic_feats.shape == (batch, out_channels // 4, 16, 16)
    assert fpn_feats[0].shape == (batch, out_channels, 4, 4)
    assert fpn_feats[1].shape == (batch, out_channels, 2, 2)
    assert fpn_feats[2].shape == (batch, out_channels, 1, 1)

    print("KERNEL_OK")
</pallas_src>

<mosaic_0001>
module attributes {stable_mosaic.version = 11 : i64} {
  func.func @_fused_conv_multi_kernel(%arg0: memref<2x16x128xf32, #tpu.memory_space<vmem>>, %arg1: memref<1x1x128x128xbf16, #tpu.memory_space<vmem>>, %arg2: memref<1x128xf32, #tpu.memory_space<vmem>>, %arg3: memref<1x128xf32, #tpu.memory_space<vmem>>, %arg4: memref<2x8x128xf32, #tpu.memory_space<vmem>>, %arg5: memref<1x1x128x128xbf16, #tpu.memory_space<vmem>>, %arg6: memref<1x128xf32, #tpu.memory_space<vmem>>, %arg7: memref<1x128xf32, #tpu.memory_space<vmem>>, %arg8: memref<2x4x128xf32, #tpu.memory_space<vmem>>, %arg9: memref<1x1x128x128xbf16, #tpu.memory_space<vmem>>, %arg10: memref<1x128xf32, #tpu.memory_space<vmem>>, %arg11: memref<1x128xf32, #tpu.memory_space<vmem>>, %arg12: memref<2x2x64xf32, #tpu.memory_space<vmem>>, %arg13: memref<1x1x64x64xbf16, #tpu.memory_space<vmem>>, %arg14: memref<1x64xf32, #tpu.memory_space<vmem>>, %arg15: memref<1x64xf32, #tpu.memory_space<vmem>>, %arg16: memref<1x2x16x128xf32, #tpu.memory_space<vmem>>, %arg17: memref<1x2x8x128xf32, #tpu.memory_space<vmem>>, %arg18: memref<1x2x4x128xf32, #tpu.memory_space<vmem>>, %arg19: memref<1x2x2x64xf32, #tpu.memory_space<vmem>>) attributes {dimension_semantics = [], scalar_prefetch = 0 : i64, scratch_operands = 0 : i64, tpu.core_type = #tpu.core_type<tc>} {
    %c0 = arith.constant 0 : index
    %c0_0 = arith.constant 0 : index
    %0 = vector.load %arg2[%c0, %c0_0] : memref<1x128xf32, #tpu.memory_space<vmem>>, vector<1x128xf32>
    %c0_1 = arith.constant 0 : index
    %c0_2 = arith.constant 0 : index
    %1 = vector.load %arg3[%c0_1, %c0_2] : memref<1x128xf32, #tpu.memory_space<vmem>>, vector<1x128xf32>
    %c0_3 = arith.constant 0 : index
    %c0_4 = arith.constant 0 : index
    %c0_5 = arith.constant 0 : index
    %2 = vector.load %arg0[%c0_3, %c0_4, %c0_5] : memref<2x16x128xf32, #tpu.memory_space<vmem>>, vector<1x16x128xf32>
    %3 = vector.shape_cast %2 : vector<1x16x128xf32> to vector<16x128xf32>
    %4 = arith.truncf %3 : vector<16x128xf32> to vector<16x128xbf16>
    %c0_6 = arith.constant 0 : index
    %c0_7 = arith.constant 0 : index
    %c0_8 = arith.constant 0 : index
    %c0_9 = arith.constant 0 : index
    %5 = vector.load %arg1[%c0_6, %c0_7, %c0_8, %c0_9] : memref<1x1x128x128xbf16, #tpu.memory_space<vmem>>, vector<1x1x128x128xbf16>
    %6 = vector.shape_cast %5 : vector<1x1x128x128xbf16> to vector<128x128xbf16>
    %cst = arith.constant dense<0.000000e+00> : vector<16x128xf32>
    %7 = tpu.matmul %4, %6, %cst {dimension_numbers = #tpu.dot_dimension_numbers<[1], [0], [0], [1], [0, 0, 1, 1], [], []>} : vector<16x128xbf16>, vector<128x128xbf16>, vector<16x128xf32> -> vector<16x128xf32>
    %8 = vector.broadcast %0 : vector<1x128xf32> to vector<16x128xf32>
    %9 = arith.mulf %7, %8 : vector<16x128xf32>
    %10 = vector.broadcast %1 : vector<1x128xf32> to vector<16x128xf32>
    %11 = arith.addf %9, %10 : vector<16x128xf32>
    %c0_10 = arith.constant 0 : index
    %c0_11 = arith.constant 0 : index
    %c0_12 = arith.constant 0 : index
    %c0_13 = arith.constant 0 : index
    %12 = vector.load %arg16[%c0_10, %c0_11, %c0_12, %c0_13] : memref<1x2x16x128xf32, #tpu.memory_space<vmem>>, vector<1x1x16x128xf32>
    %13 = vector.shape_cast %12 : vector<1x1x16x128xf32> to vector<16x128xf32>
    %14 = vector.shape_cast %11 : vector<16x128xf32> to vector<1x1x16x128xf32>
    tpu.vector_store %arg16[%c0_10, %c0_11, %c0_12, %c0_13], %14 {strides = array<i32>} : memref<1x2x16x128xf32, #tpu.memory_space<vmem>>, vector<1x1x16x128xf32>,
    %c1 = arith.constant 1 : index
    %c0_14 = arith.constant 0 : index
    %c0_15 = arith.constant 0 : index
    %15 = vector.load %arg0[%c1, %c0_14, %c0_15] : memref<2x16x128xf32, #tpu.memory_space<vmem>>, vector<1x16x128xf32>
    %16 = vector.shape_cast %15 : vector<1x16x128xf32> to vector<16x128xf32>
    %17 = arith.truncf %16 : vector<16x128xf32> to vector<16x128xbf16>
    %c0_16 = arith.constant 0 : index
    %c0_17 = arith.constant 0 : index
    %c0_18 = arith.constant 0 : index
    %c0_19 = arith.constant 0 : index
    %18 = vector.load %arg1[%c0_16, %c0_17, %c0_18, %c0_19] : memref<1x1x128x128xbf16, #tpu.memory_space<vmem>>, vector<1x1x128x128xbf16>
    %19 = vector.shape_cast %18 : vector<1x1x128x128xbf16> to vector<128x128xbf16>
    %cst_20 = arith.constant dense<0.000000e+00> : vector<16x128xf32>
    %20 = tpu.matmul %17, %19, %cst_20 {dimension_numbers = #tpu.dot_dimension_numbers<[1], [0], [0], [1], [0, 0, 1, 1], [], []>} : vector<16x128xbf16>, vector<128x128xbf16>, vector<16x128xf32> -> vector<16x128xf32>
    %21 = vector.broadcast %0 : vector<1x128xf32> to vector<16x128xf32>
    %22 = arith.mulf %20, %21 : vector<16x128xf32>
    %23 = vector.broadcast %1 : vector<1x128xf32> to vector<16x128xf32>
    %24 = arith.addf %22, %23 : vector<16x128xf32>
    %c0_21 = arith.constant 0 : index
    %c1_22 = arith.constant 1 : index
    %c0_23 = arith.constant 0 : index
    %c0_24 = arith.constant 0 : index
    %25 = vector.load %arg16[%c0_21, %c1_22, %c0_23, %c0_24] : memref<1x2x16x128xf32, #tpu.memory_space<vmem>>, vector<1x1x16x128xf32>
    %26 = vector.shape_cast %25 : vector<1x1x16x128xf32> to vector<16x128xf32>
    %27 = vector.shape_cast %24 : vector<16x128xf32> to vector<1x1x16x128xf32>
    tpu.vector_store %arg16[%c0_21, %c1_22, %c0_23, %c0_24], %27 {strides = array<i32>} : memref<1x2x16x128xf32, #tpu.memory_space<vmem>>, vector<1x1x16x128xf32>,
    %c0_25 = arith.constant 0 : index
    %c0_26 = arith.constant 0 : index
    %28 = vector.load %arg6[%c0_25, %c0_26] : memref<1x128xf32, #tpu.memory_space<vmem>>, vector<1x128xf32>
    %c0_27 = arith.constant 0 : index
    %c0_28 = arith.constant 0 : index
    %29 = vector.load %arg7[%c0_27, %c0_28] : memref<1x128xf32, #tpu.memory_space<vmem>>, vector<1x128xf32>
    %c0_29 = arith.constant 0 : index
    %c0_30 = arith.constant 0 : index
    %c0_31 = arith.constant 0 : index
    %30 = vector.load %arg4[%c0_29, %c0_30, %c0_31] : memref<2x8x128xf32, #tpu.memory_space<vmem>>, vector<1x8x128xf32>
    %31 = vector.shape_cast %30 : vector<1x8x128xf32> to vector<8x128xf32>
    %32 = arith.truncf %31 : vector<8x128xf32> to vector<8x128xbf16>
    %c0_32 = arith.constant 0 : index
    %c0_33 = arith.constant 0 : index
    %c0_34 = arith.constant 0 : index
    %c0_35 = arith.constant 0 : index
    %33 = vector.load %arg5[%c0_32, %c0_33, %c0_34, %c0_35] : memref<1x1x128x128xbf16, #tpu.memory_space<vmem>>, vector<1x1x128x128xbf16>
    %34 = vector.shape_cast %33 : vector<1x1x128x128xbf16> to vector<128x128xbf16>
    %cst_36 = arith.constant dense<0.000000e+00> : vector<8x128xf32>
    %35 = tpu.matmul %32, %34, %cst_36 {dimension_numbers = #tpu.dot_dimension_numbers<[1], [0], [0], [1], [0, 0, 1, 1], [], []>} : vector<8x128xbf16>, vector<128x128xbf16>, vector<8x128xf32> -> vector<8x128xf32>
    %36 = vector.broadcast %28 : vector<1x128xf32> to vector<8x128xf32>
    %37 = arith.mulf %35, %36 : vector<8x128xf32>
    %38 = vector.broadcast %29 : vector<1x128xf32> to vector<8x128xf32>
    %39 = arith.addf %37, %38 : vector<8x128xf32>
    %c0_37 = arith.constant 0 : index
    %c0_38 = arith.constant 0 : index
    %c0_39 = arith.constant 0 : index
    %c0_40 = arith.constant 0 : index
    %40 = vector.load %arg17[%c0_37, %c0_38, %c0_39, %c0_40] : memref<1x2x8x128xf32, #tpu.memory_space<vmem>>, vector<1x1x8x128xf32>
    %41 = vector.shape_cast %40 : vector<1x1x8x128xf32> to vector<8x128xf32>
    %42 = vector.shape_cast %39 : vector<8x128xf32> to vector<1x1x8x128xf32>
    tpu.vector_store %arg17[%c0_37, %c0_38, %c0_39, %c0_40], %42 {strides = array<i32>} : memref<1x2x8x128xf32, #tpu.memory_space<vmem>>, vector<1x1x8x128xf32>,
    %c1_41 = arith.constant 1 : index
    %c0_42 = arith.constant 0 : index
    %c0_43 = arith.constant 0 : index
    %43 = vector.load %arg4[%c1_41, %c0_42, %c0_43] : memref<2x8x128xf32, #tpu.memory_space<vmem>>, vector<1x8x128xf32>
    %44 = vector.shape_cast %43 : vector<1x8x128xf32> to vector<8x128xf32>
    %45 = arith.truncf %44 : vector<8x128xf32> to vector<8x128xbf16>
    %c0_44 = arith.constant 0 : index
    %c0_45 = arith.constant 0 : index
    %c0_46 = arith.constant 0 : index
    %c0_47 = arith.constant 0 : index
    %46 = vector.load %arg5[%c0_44, %c0_45, %c0_46, %c0_47] : memref<1x1x128x128xbf16, #tpu.memory_space<vmem>>, vector<1x1x128x128xbf16>
    %47 = vector.shape_cast %46 : vector<1x1x128x128xbf16> to vector<128x128xbf16>
    %cst_48 = arith.constant dense<0.000000e+00> : vector<8x128xf32>
    %48 = tpu.matmul %45, %47, %cst_48 {dimension_numbers = #tpu.dot_dimension_numbers<[1], [0], [0], [1], [0, 0, 1, 1], [], []>} : vector<8x128xbf16>, vector<128x128xbf16>, vector<8x128xf32> -> vector<8x128xf32>
    %49 = vector.broadcast %28 : vector<1x128xf32> to vector<8x128xf32>
    %50 = arith.mulf %48, %49 : vector<8x128xf32>
    %51 = vector.broadcast %29 : vector<1x128xf32> to vector<8x128xf32>
    %52 = arith.addf %50, %51 : vector<8x128xf32>
    %c0_49 = arith.constant 0 : index
    %c1_50 = arith.constant 1 : index
    %c0_51 = arith.constant 0 : index
    %c0_52 = arith.constant 0 : index
    %53 = vector.load %arg17[%c0_49, %c1_50, %c0_51, %c0_52] : memref<1x2x8x128xf32, #tpu.memory_space<vmem>>, vector<1x1x8x128xf32>
    %54 = vector.shape_cast %53 : vector<1x1x8x128xf32> to vector<8x128xf32>
    %55 = vector.shape_cast %52 : vector<8x128xf32> to vector<1x1x8x128xf32>
    tpu.vector_store %arg17[%c0_49, %c1_50, %c0_51, %c0_52], %55 {strides = array<i32>} : memref<1x2x8x128xf32, #tpu.memory_space<vmem>>, vector<1x1x8x128xf32>,
    %c0_53 = arith.constant 0 : index
    %c0_54 = arith.constant 0 : index
    %56 = vector.load %arg10[%c0_53, %c0_54] : memref<1x128xf32, #tpu.memory_space<vmem>>, vector<1x128xf32>
    %c0_55 = arith.constant 0 : index
    %c0_56 = arith.constant 0 : index
    %57 = vector.load %arg11[%c0_55, %c0_56] : memref<1x128xf32, #tpu.memory_space<vmem>>, vector<1x128xf32>
    %c0_57 = arith.constant 0 : index
    %c0_58 = arith.constant 0 : index
    %c0_59 = arith.constant 0 : index
    %58 = vector.load %arg8[%c0_57, %c0_58, %c0_59] : memref<2x4x128xf32, #tpu.memory_space<vmem>>, vector<1x4x128xf32>
    %59 = vector.shape_cast %58 : vector<1x4x128xf32> to vector<4x128xf32>
    %60 = arith.truncf %59 : vector<4x128xf32> to vector<4x128xbf16>
    %c0_60 = arith.constant 0 : index
    %c0_61 = arith.constant 0 : index
    %c0_62 = arith.constant 0 : index
    %c0_63 = arith.constant 0 : index
    %61 = vector.load %arg9[%c0_60, %c0_61, %c0_62, %c0_63] : memref<1x1x128x128xbf16, #tpu.memory_space<vmem>>, vector<1x1x128x128xbf16>
    %62 = vector.shape_cast %61 : vector<1x1x128x128xbf16> to vector<128x128xbf16>
    %cst_64 = arith.constant dense<0.000000e+00> : vector<4x128xf32>
    %63 = tpu.matmul %60, %62, %cst_64 {dimension_numbers = #tpu.dot_dimension_numbers<[1], [0], [0], [1], [0, 0, 1, 1], [], []>} : vector<4x128xbf16>, vector<128x128xbf16>, vector<4x128xf32> -> vector<4x128xf32>
    %64 = vector.broadcast %56 : vector<1x128xf32> to vector<4x128xf32>
    %65 = arith.mulf %63, %64 : vector<4x128xf32>
    %66 = vector.broadcast %57 : vector<1x128xf32> to vector<4x128xf32>
    %67 = arith.addf %65, %66 : vector<4x128xf32>
    %c0_65 = arith.constant 0 : index
    %c0_66 = arith.constant 0 : index
    %c0_67 = arith.constant 0 : index
    %c0_68 = arith.constant 0 : index
    %68 = vector.load %arg18[%c0_65, %c0_66, %c0_67, %c0_68] : memref<1x2x4x128xf32, #tpu.memory_space<vmem>>, vector<1x1x4x128xf32>
    %69 = vector.shape_cast %68 : vector<1x1x4x128xf32> to vector<4x128xf32>
    %70 = vector.shape_cast %67 : vector<4x128xf32> to vector<1x1x4x128xf32>
    tpu.vector_store %arg18[%c0_65, %c0_66, %c0_67, %c0_68], %70 {strides = array<i32>} : memref<1x2x4x128xf32, #tpu.memory_space<vmem>>, vector<1x1x4x128xf32>,
    %c1_69 = arith.constant 1 : index
    %c0_70 = arith.constant 0 : index
    %c0_71 = arith.constant 0 : index
    %71 = vector.load %arg8[%c1_69, %c0_70, %c0_71] : memref<2x4x128xf32, #tpu.memory_space<vmem>>, vector<1x4x128xf32>
    %72 = vector.shape_cast %71 : vector<1x4x128xf32> to vector<4x128xf32>
    %73 = arith.truncf %72 : vector<4x128xf32> to vector<4x128xbf16>
    %c0_72 = arith.constant 0 : index
    %c0_73 = arith.constant 0 : index
    %c0_74 = arith.constant 0 : index
    %c0_75 = arith.constant 0 : index
    %74 = vector.load %arg9[%c0_72, %c0_73, %c0_74, %c0_75] : memref<1x1x128x128xbf16, #tpu.memory_space<vmem>>, vector<1x1x128x128xbf16>
    %75 = vector.shape_cast %74 : vector<1x1x128x128xbf16> to vector<128x128xbf16>
    %cst_76 = arith.constant dense<0.000000e+00> : vector<4x128xf32>
    %76 = tpu.matmul %73, %75, %cst_76 {dimension_numbers = #tpu.dot_dimension_numbers<[1], [0], [0], [1], [0, 0, 1, 1], [], []>} : vector<4x128xbf16>, vector<128x128xbf16>, vector<4x128xf32> -> vector<4x128xf32>
    %77 = vector.broadcast %56 : vector<1x128xf32> to vector<4x128xf32>
    %78 = arith.mulf %76, %77 : vector<4x128xf32>
    %79 = vector.broadcast %57 : vector<1x128xf32> to vector<4x128xf32>
    %80 = arith.addf %78, %79 : vector<4x128xf32>
    %c0_77 = arith.constant 0 : index
    %c1_78 = arith.constant 1 : index
    %c0_79 = arith.constant 0 : index
    %c0_80 = arith.constant 0 : index
    %81 = vector.load %arg18[%c0_77, %c1_78, %c0_79, %c0_80] : memref<1x2x4x128xf32, #tpu.memory_space<vmem>>, vector<1x1x4x128xf32>
    %82 = vector.shape_cast %81 : vector<1x1x4x128xf32> to vector<4x128xf32>
    %83 = vector.shape_cast %80 : vector<4x128xf32> to vector<1x1x4x128xf32>
    tpu.vector_store %arg18[%c0_77, %c1_78, %c0_79, %c0_80], %83 {strides = array<i32>} : memref<1x2x4x128xf32, #tpu.memory_space<vmem>>, vector<1x1x4x128xf32>,
    %c0_81 = arith.constant 0 : index
    %c0_82 = arith.constant 0 : index
    %84 = vector.load %arg14[%c0_81, %c0_82] : memref<1x64xf32, #tpu.memory_space<vmem>>, vector<1x64xf32>
    %c0_83 = arith.constant 0 : index
    %c0_84 = arith.constant 0 : index
    %85 = vector.load %arg15[%c0_83, %c0_84] : memref<1x64xf32, #tpu.memory_space<vmem>>, vector<1x64xf32>
    %c0_85 = arith.constant 0 : index
    %c0_86 = arith.constant 0 : index
    %c0_87 = arith.constant 0 : index
    %86 = vector.load %arg12[%c0_85, %c0_86, %c0_87] : memref<2x2x64xf32, #tpu.memory_space<vmem>>, vector<1x2x64xf32>
    %87 = vector.shape_cast %86 : vector<1x2x64xf32> to vector<2x64xf32>
    %88 = arith.truncf %87 : vector<2x64xf32> to vector<2x64xbf16>
    %c0_88 = arith.constant 0 : index
    %c0_89 = arith.constant 0 : index
    %c0_90 = arith.constant 0 : index
    %c0_91 = arith.constant 0 : index
    %89 = vector.load %arg13[%c0_88, %c0_89, %c0_90, %c0_91] : memref<1x1x64x64xbf16, #tpu.memory_space<vmem>>, vector<1x1x64x64xbf16>
    %90 = vector.shape_cast %89 : vector<1x1x64x64xbf16> to vector<64x64xbf16>
    %cst_92 = arith.constant dense<0.000000e+00> : vector<2x64xf32>
    %91 = tpu.matmul %88, %90, %cst_92 {dimension_numbers = #tpu.dot_dimension_numbers<[1], [0], [0], [1], [0, 0, 1, 1], [], []>} : vector<2x64xbf16>, vector<64x64xbf16>, vector<2x64xf32> -> vector<2x64xf32>
    %92 = vector.broadcast %84 : vector<1x64xf32> to vector<2x64xf32>
    %93 = arith.mulf %91, %92 : vector<2x64xf32>
    %94 = vector.broadcast %85 : vector<1x64xf32> to vector<2x64xf32>
    %95 = arith.addf %93, %94 : vector<2x64xf32>
    %c0_93 = arith.constant 0 : index
    %c0_94 = arith.constant 0 : index
    %c0_95 = arith.constant 0 : index
    %c0_96 = arith.constant 0 : index
    %96 = vector.load %arg19[%c0_93, %c0_94, %c0_95, %c0_96] : memref<1x2x2x64xf32, #tpu.memory_space<vmem>>, vector<1x1x2x64xf32>
    %97 = vector.shape_cast %96 : vector<1x1x2x64xf32> to vector<2x64xf32>
    %98 = vector.shape_cast %95 : vector<2x64xf32> to vector<1x1x2x64xf32>
    tpu.vector_store %arg19[%c0_93, %c0_94, %c0_95, %c0_96], %98 {strides = array<i32>} : memref<1x2x2x64xf32, #tpu.memory_space<vmem>>, vector<1x1x2x64xf32>,
    %c1_97 = arith.constant 1 : index
    %c0_98 = arith.constant 0 : index
    %c0_99 = arith.constant 0 : index
    %99 = vector.load %arg12[%c1_97, %c0_98, %c0_99] : memref<2x2x64xf32, #tpu.memory_space<vmem>>, vector<1x2x64xf32>
    %100 = vector.shape_cast %99 : vector<1x2x64xf32> to vector<2x64xf32>
    %101 = arith.truncf %100 : vector<2x64xf32> to vector<2x64xbf16>
    %c0_100 = arith.constant 0 : index
    %c0_101 = arith.constant 0 : index
    %c0_102 = arith.constant 0 : index
    %c0_103 = arith.constant 0 : index
    %102 = vector.load %arg13[%c0_100, %c0_101, %c0_102, %c0_103] : memref<1x1x64x64xbf16, #tpu.memory_space<vmem>>, vector<1x1x64x64xbf16>
    %103 = vector.shape_cast %102 : vector<1x1x64x64xbf16> to vector<64x64xbf16>
    %cst_104 = arith.constant dense<0.000000e+00> : vector<2x64xf32>
    %104 = tpu.matmul %101, %103, %cst_104 {dimension_numbers = #tpu.dot_dimension_numbers<[1], [0], [0], [1], [0, 0, 1, 1], [], []>} : vector<2x64xbf16>, vector<64x64xbf16>, vector<2x64xf32> -> vector<2x64xf32>
    %105 = vector.broadcast %84 : vector<1x64xf32> to vector<2x64xf32>
    %106 = arith.mulf %104, %105 : vector<2x64xf32>
    %107 = vector.broadcast %85 : vector<1x64xf32> to vector<2x64xf32>
    %108 = arith.addf %106, %107 : vector<2x64xf32>
    %c0_105 = arith.constant 0 : index
    %c1_106 = arith.constant 1 : index
    %c0_107 = arith.constant 0 : index
    %c0_108 = arith.constant 0 : index
    %109 = vector.load %arg19[%c0_105, %c1_106, %c0_107, %c0_108] : memref<1x2x2x64xf32, #tpu.memory_space<vmem>>, vector<1x1x2x64xf32>
    %110 = vector.shape_cast %109 : vector<1x1x2x64xf32> to vector<2x64xf32>
    %111 = vector.shape_cast %108 : vector<2x64xf32> to vector<1x1x2x64xf32>
    tpu.vector_store %arg19[%c0_105, %c1_106, %c0_107, %c0_108], %111 {strides = array<i32>} : memref<1x2x2x64xf32, #tpu.memory_space<vmem>>, vector<1x1x2x64xf32>,
    return
  }
}

</mosaic_0001>

<bundles_post_ra>
// kernel: tpu_custom_call.1
= control target key start
LH: loop header
LB: loop body
LE: loop exit
PB: predicated region body
PF: predicated region fallthrough
CT: control target
= control target key end

     0   :  { %s2073_s0 = inlined_call_operand.hbm [shape: f32[2,16,128], index: 0, kind: input, shape index: {}]   ;;  %s2074_s1 = inlined_call_operand.hbm [shape: bf16[1,1,128,128], index: 1, kind: input, shape index: {}]   ;;  %s2075_s2 = inlined_call_operand.vmem [shape: f32[1,128], index: 2, kind: input, shape index: {}]   ;;  %s2076_s3 = inlined_call_operand.vmem [shape: f32[1,128], index: 3, kind: input, shape index: {}]   ;;  %s2077_s4 = inlined_call_operand.hbm [shape: f32[2,8,128], index: 4, kind: input, shape index: {}]   ;;  %s2078_s5 = inlined_call_operand.hbm [shape: bf16[1,1,128,128], index: 5, kind: input, shape index: {}]   ;;  %s2079_s6 = inlined_call_operand.vmem [shape: f32[1,128], index: 6, kind: input, shape index: {}]   ;;  %s2080_s7 = inlined_call_operand.vmem [shape: f32[1,128], index: 7, kind: input, shape index: {}]   ;;  %s2081_s8 = inlined_call_operand.vmem [shape: f32[2,4,128], index: 8, kind: input, shape index: {}]   ;;  %s2082_s9 = inlined_call_operand.hbm [shape: bf16[1,1,128,128], index: 9, kind: input, shape index: {}]   ;;  %s2083_s10 = inlined_call_operand.vmem [shape: f32[1,128], index: 10, kind: input, shape index: {}]   ;;  %s2084_s11 = inlined_call_operand.hbm [shape: f32[1,128], index: 11, kind: input, shape index: {}]   ;;  %s2085_s12 = inlined_call_operand.vmem [shape: f32[2,2,64], index: 12, kind: input, shape index: {}]   ;;  %s2086_s13 = inlined_call_operand.vmem [shape: bf16[1,1,64,64], index: 13, kind: input, shape index: {}]   ;;  %s2087_s14 = inlined_call_operand.vmem [shape: f32[1,64], index: 14, kind: input, shape index: {}]   ;;  %s2088_s15 = inlined_call_operand.vmem [shape: f32[1,64], index: 15, kind: input, shape index: {}]   ;;  %s2089_s16 = inlined_call_operand.hbm [shape: f32[1,2,16,128], index: 16, kind: output, shape index: {0}]   ;;  %s2090_s17 = inlined_call_operand.hbm [shape: f32[1,2,8,128], index: 17, kind: output, shape index: {1}]   ;;  %s2091_s18 = inlined_call_operand.hbm [shape: f32[1,2,4,128], index: 18, kind: output, shape index: {2}]   ;;  %s2092_s19 = inlined_call_operand.hbm [shape: f32[1,2,2,64], index: 19, kind: output, shape index: {3}]  }
   0x1   :  { %2098 = sst [smem:[#allocation26_spill]] %s2073_s0 }
   0x2   :  { %2099 = sst [smem:[#allocation27_spill]] %s2074_s1 }
   0x3   :  { %2100 = sst [smem:[#allocation28_spill]] %s2075_s2 }
   0x4   :  { %2101 = sst [smem:[#allocation29_spill]] %s2076_s3 }
   0x5   :  { %2102 = sst [smem:[#allocation30_spill]] %s2088_s15 }
   0x6   :  { %2103 = sst [smem:[#allocation31_spill]] %s2092_s19 }
   0x7   :  { %25 = vsyncpa [#allocation3], 0 }
   0x8   :  { %26 = vsyncpa [#allocation6], 0 }
   0x9   :  { %27 = vsyncpa [#allocation9], 0 }
   0xa   :  { %28 = vsyncpa [#allocation12], 0 }
   0xb   :  { %29 = vsyncpa [#allocation4], 0 }
   0xc   :  { %30 = vsyncpa [#allocation15], 0 }
   0xd   :  { %31 = vsyncpa [#allocation18], 0  ;;  %s1682_s0 = smov [#allocation5]   ;;  %s2104_s1 = sld [smem:[#allocation27_spill]] }
   0xe   :  { %s49_s30 = sshll.u32 %s1682_s0, 4  ;;  %s50_s30 = int_to_ptr.vmem [resolvable:$true] %s49_s30 }
  0x13   :  { %s1448_s22 = scalar_lea.hbm %s2104_s1, 1024 }
  0x14   :  { %p1449_p0 = scmp.ne.s32.totalorder %s2104_s1, %s1448_s22  ;;  %p1452_p1 = scmp.lt.u32.totalorder %s1448_s22, %s2104_s1 }
  0x16   :  { %p1454_p2 = pnand %p1452_p1, %p1449_p0 }
  0x18   :  { %1457 = shalt.err (!%p1454_p2)
}
  0x19   :  { %s1458_s3 = scalar_lea.vmem %s50_s30, 1024  ;;  %p1463_p4 = scmp.lt.s32.totalorder %s50_s30, %s50_s30 }
  0x1a   :  { %p1459_p3 = scmp.ne.s32.totalorder %s50_s30, %s1458_s3  ;;  %p1464_p5 = scmp.lt.s32.totalorder %s1458_s3, %s1458_s3 }
  0x1c   :  { %p1465_p6 = por %p1464_p5, %p1463_p4 }
  0x1e   :  { %p1466_p7 = pnand %p1465_p6, %p1459_p3 }
  0x20   :  { %1469 = shalt.err (!%p1466_p7)
}
  0x21   :  { %s2096_s26 = smov 64   ;;  %s1684_s27 = smov 4  }
  0x22   :  { %55 = dma.hbm_to_vmem [thread:$0]  %s2104_s1, 1024, %s50_s30, [#allocation6], %s2096_s26, %s2096_s26, %s1684_s27  }
  0x23   :  { %s1685_s0 = smov [#allocation8]   ;;  %s1686_s21 = smov [#allocation2]  }
  0x24   :  { %s77_s20 = sshll.u32 %s1685_s0, 4  ;;  %s37_s22 = sshll.u32 %s1686_s21, 4  ;;  %s78_s20 = int_to_ptr.vmem [resolvable:$true] %s77_s20  ;;  %s38_s22 = int_to_ptr.vmem [resolvable:$true] %s37_s22 }
  0x25   :  { %s1470_s24 = scalar_lea.hbm %s2078_s5, 1024 }
  0x26   :  { %p1471_p8 = scmp.ne.s32.totalorder %s2078_s5, %s1470_s24  ;;  %p1474_p9 = scmp.lt.u32.totalorder %s1470_s24, %s2078_s5 }
  0x28   :  { %p1476_p10 = pnand %p1474_p9, %p1471_p8 }
  0x2a   :  { %1479 = shalt.err (!%p1476_p10)
}
  0x2b   :  { %s1480_s30 = scalar_lea.vmem %s78_s20, 1024  ;;  %p1485_p12 = scmp.lt.s32.totalorder %s78_s20, %s78_s20 }
  0x2c   :  { %p1481_p11 = scmp.ne.s32.totalorder %s78_s20, %s1480_s30  ;;  %p1486_p13 = scmp.lt.s32.totalorder %s1480_s30, %s1480_s30 }
  0x2e   :  { %p1487_p0 = por %p1486_p13, %p1485_p12 }
  0x30   :  { %p1488_p1 = pnand %p1487_p0, %p1481_p11 }
  0x32   :  { %1491 = shalt.err (!%p1488_p1)
}
  0x33   :  { %83 = dma.hbm_to_vmem [thread:$0]  %s2078_s5, 1024, %s78_s20, [#allocation9], %s2096_s26, %s2096_s26, %s1684_s27  }
  0x34   :  { %s2105_s19 = sld [smem:[#allocation26_spill]] }
  0x3a   :  { %s1492_s0 = scalar_lea.hbm %s2105_s19, 512 }
  0x3b   :  { %p1493_p2 = scmp.ne.s32.totalorder %s2105_s19, %s1492_s0  ;;  %p1496_p3 = scmp.lt.u32.totalorder %s1492_s0, %s2105_s19 }
  0x3d   :  { %p1498_p4 = pnand %p1496_p3, %p1493_p2 }
  0x3f   :  { %1501 = shalt.err (!%p1498_p4)
}
  0x40   :  { %s1502_s25 = scalar_lea.vmem %s38_s22, 512  ;;  %p1507_p6 = scmp.lt.s32.totalorder %s38_s22, %s38_s22 }
  0x41   :  { %p1503_p5 = scmp.ne.s32.totalorder %s38_s22, %s1502_s25  ;;  %p1508_p7 = scmp.lt.s32.totalorder %s1502_s25, %s1502_s25 }
  0x43   :  { %p1509_p8 = por %p1508_p7, %p1507_p6 }
  0x45   :  { %p1510_p9 = pnand %p1509_p8, %p1503_p5 }
  0x47   :  { %1513 = shalt.err (!%p1510_p9)
}
  0x48   :  { %s1687_s5 = smov 128   ;;  %s1688_s20 = smov 8  }
  0x49   :  { %43 = dma.hbm_to_vmem [thread:$0]  %s2105_s19, 512, %s38_s22, [#allocation3], %s1687_s5, %s1687_s5, %s1688_s20  }
  0x4a   :  { %s1689_s1 = smov [#allocation7]   ;;  %s1690_s29 = smov [#allocation10]  }
  0x4b   :  { %s65_s28 = sshll.u32 %s1689_s1, 4  ;;  %s95_s15 = sshll.u32 %s1690_s29, 4  ;;  %s66_s28 = int_to_ptr.vmem [resolvable:$true] %s65_s28  ;;  %s96_s15 = int_to_ptr.vmem [resolvable:$true] %s95_s15 }
  0x4c   :  { %s1514_s2 = scalar_lea.hbm %s2077_s4, 256 }
  0x4d   :  { %p1515_p10 = scmp.ne.s32.totalorder %s2077_s4, %s1514_s2  ;;  %p1518_p11 = scmp.lt.u32.totalorder %s1514_s2, %s2077_s4 }
  0x4f   :  { %p1520_p12 = pnand %p1518_p11, %p1515_p10 }
  0x51   :  { %1523 = shalt.err (!%p1520_p12)
}
  0x52   :  { %s1524_s22 = scalar_lea.vmem %s66_s28, 256  ;;  %p1529_p0 = scmp.lt.s32.totalorder %s66_s28, %s66_s28 }
  0x53   :  { %p1525_p13 = scmp.ne.s32.totalorder %s66_s28, %s1524_s22  ;;  %p1530_p1 = scmp.lt.s32.totalorder %s1524_s22, %s1524_s22 }
  0x55   :  { %p1531_p2 = por %p1530_p1, %p1529_p0 }
  0x57   :  { %p1532_p3 = pnand %p1531_p2, %p1525_p13 }
  0x59   :  { %1535 = shalt.err (!%p1532_p3)
}
  0x5a   :  { %71 = dma.hbm_to_vmem [thread:$0]  %s2077_s4, 256, %s66_s28, [#allocation6], %s1687_s5, %s1687_s5, %s1688_s20  }
  0x5b   :  { %s1536_s1 = scalar_lea.hbm %s2082_s9, 1024 }
  0x5c   :  { %p1537_p4 = scmp.ne.s32.totalorder %s2082_s9, %s1536_s1  ;;  %p1540_p5 = scmp.lt.u32.totalorder %s1536_s1, %s2082_s9 }
  0x5e   :  { %p1542_p6 = pnand %p1540_p5, %p1537_p4 }
  0x60   :  { %1545 = shalt.err (!%p1542_p6)
}
  0x61   :  { %s1546_s23 = scalar_lea.vmem %s96_s15, 1024  ;;  %p1551_p8 = scmp.lt.s32.totalorder %s96_s15, %s96_s15 }
  0x62   :  { %p1547_p7 = scmp.ne.s32.totalorder %s96_s15, %s1546_s23  ;;  %p1552_p9 = scmp.lt.s32.totalorder %s1546_s23, %s1546_s23 }
  0x64   :  { %p1553_p10 = por %p1552_p9, %p1551_p8 }
  0x66   :  { %p1554_p11 = pnand %p1553_p10, %p1547_p7 }
  0x68   :  { %1557 = shalt.err (!%p1554_p11)
}
  0x69   :  { %s2106_s4 = smov 64   ;;  %s1691_s25 = smov [#allocation11]  }
  0x6a   :  { %101 = dma.hbm_to_vmem [thread:$0]  %s2082_s9, 1024, %s96_s15, [#allocation9], %s2106_s4, %s2106_s4, %s1684_s27  }
  0x6b   :  { %s110_s22 = sshll.u32 %s1691_s25, 4  ;;  %s1558_s30 = scalar_lea.hbm %s2084_s11, 16  ;;  %s111_s22 = int_to_ptr.vmem [resolvable:$true] %s110_s22 }
  0x6c   :  { %p1559_p12 = scmp.ne.s32.totalorder %s2084_s11, %s1558_s30  ;;  %p1562_p13 = scmp.lt.u32.totalorder %s1558_s30, %s2084_s11 }
  0x6e   :  { %p1564_p0 = pnand %p1562_p13, %p1559_p12 }
  0x70   :  { %1567 = shalt.err (!%p1564_p0)
}
  0x71   :  { %s1568_s21 = scalar_lea.vmem %s111_s22, 16  ;;  %s1572_s9 = scalar_lea.vmem %s111_s22, 32 }
  0x72   :  { %p1569_p1 = scmp.ne.s32.totalorder %s111_s22, %s1568_s21  ;;  %p1573_p2 = scmp.lt.s32.totalorder %s111_s22, %s111_s22 }
  0x73   :  { %p1574_p3 = scmp.lt.s32.totalorder %s1572_s9, %s1568_s21 }
  0x75   :  { %p1575_p4 = por %p1574_p3, %p1573_p2 }
  0x77   :  { %p1576_p5 = pnand %p1575_p4, %p1569_p1 }
  0x79   :  { %1579 = shalt.err (!%p1576_p5)
}
  0x7a   :  { %113 = dma.hbm_to_vmem [thread:$0]  %s2084_s11, 16, %s111_s22, [#allocation12]  }
  0x7b   :  { %1668 = dma.done.wait [#allocation3], 512  }
  0x7c   :  { %1669 = vsyncadd [#allocation3], 4294966784 }
  0x7d   :  { %1670 = dma.done.wait [#allocation6], 1280  }
  0x7e   :  { %1671 = vsyncadd [#allocation6], 4294966016 }
  0x7f   :  { %1672 = dma.done.wait [#allocation9], 2048  }
  0x80   :  { %1673 = vsyncadd [#allocation9], 4294965248 }
  0x81   :  { %1674 = dma.done.wait [#allocation12], 16  }
  0x82   :  { %1675 = vsyncadd [#allocation12], 4294967280  ;;  %v1692_v0 = vmov 0.0   ;;  %vm1693_vm0 = vmmov 0   ;;  %v1392_v1 = vld [vmem:[#allocation5] sm:$0xff]   ;;  %v1394_v3 = vld [vmem:[#allocation5 + $0x8] sm:$0xff]  }
  0x83   :  { %1230 = vmatprep.subr.bf16.mxu0 %v1692_v0  ;;  %1250 = vmatprep.subr.bf16.mxu1 %v1692_v0  ;;  %v1393_v2 = vld [vmem:[#allocation5] sm:$0xff]   ;;  %v1395_v4 = vld [vmem:[#allocation5 + $0x8] sm:$0xff]   ;;  %v1396_v5 = vld [vmem:[#allocation5 + $0x10] sm:$0xff]   ;;  %vm889_vm1 = vcmask 523264  }
  0x84   :  { %1246 = vmatprep.mubr.msk.bf16.mxu0 %vm1693_vm0, %v1692_v0  ;;  %1266 = vmatprep.mubr.msk.bf16.mxu1 %vm1693_vm0, %v1692_v0  ;;  %v1397_v6 = vld [vmem:[#allocation5 + $0x10] sm:$0xff]   ;;  %v1398_v7 = vld [vmem:[#allocation5 + $0x18] sm:$0xff]   ;;  %v1400_v9 = vld [vmem:[#allocation5 + $0x20] sm:$0xff]  }
  0x85   :  { %1231 = vmatpush3.bf16.msra.mxu0 %v1392_v1  ;;  %1251 = vmatpush3.bf16.msra.mxu1 %v1393_v2  ;;  %v1399_v8 = vld [vmem:[#allocation5 + $0x18] sm:$0xff]   ;;  %v1401_v10 = vld [vmem:[#allocation5 + $0x20] sm:$0xff]   ;;  %v1402_v11 = vld [vmem:[#allocation5 + $0x28] sm:$0xff]  }
  0x86   :  { %1232 = vmatprep.subr.bf16.mxu0 %v1692_v0  ;;  %1252 = vmatprep.subr.bf16.mxu1 %v1692_v0  ;;  %v1403_v12 = vld [vmem:[#allocation5 + $0x28] sm:$0xff]   ;;  %v1404_v13 = vld [vmem:[#allocation5 + $0x30] sm:$0xff]   ;;  %v1406_v15 = vld [vmem:[#allocation5 + $0x38] sm:$0xff]  }
  0x87   :  { %v1405_v14 = vld [vmem:[#allocation5 + $0x30] sm:$0xff]   ;;  %v143_v16 = vld [vmem:[#allocation2] sm:$0xff]  ;;  %v1407_v17 = vld [vmem:[#allocation5 + $0x38] sm:$0xff]  }
  0x88   :  { %v144_v18 = vld [vmem:[#allocation2 + $0x8] sm:$0xff]  ;;  %v270_v19 = vld [vmem:[#allocation2 + $0x10] sm:$0xff]  ;;  %v271_v20 = vld [vmem:[#allocation2 + $0x18] sm:$0xff] }
  0x89   :  { %1233 = vmatpush3.bf16.msra.mxu0 %v1394_v3  ;;  %1253 = vmatpush3.bf16.msra.mxu1 %v1395_v4  ;;  %v145_v21 = vpack.c.bf16 %v144_v18, %v143_v16  ;;  %v272_v22 = vpack.c.bf16 %v271_v20, %v270_v19  ;;  %v1408_v23 = vld [vmem:[#allocation8] sm:$0xff]   ;;  %v1410_v25 = vld [vmem:[#allocation8 + $0x8] sm:$0xff]   ;;  %v1412_v27 = vld [vmem:[#allocation8 + $0x10] sm:$0xff]  }
  0x8a   :  { %1234 = vmatprep.subr.bf16.mxu0 %v1692_v0  ;;  %1254 = vmatprep.subr.bf16.mxu1 %v1692_v0  ;;  %v1409_v24 = vld [vmem:[#allocation8] sm:$0xff]   ;;  %v1411_v26 = vld [vmem:[#allocation8 + $0x8] sm:$0xff]   ;;  %v1413_v28 = vld [vmem:[#allocation8 + $0x10] sm:$0xff]  }
  0x8b   :  { %v1414_v29 = vld [vmem:[#allocation8 + $0x18] sm:$0xff]   ;;  %v1416_v31 = vld [vmem:[#allocation8 + $0x20] sm:$0xff]   ;;  %v1418_v33 = vld [vmem:[#allocation8 + $0x28] sm:$0xff]  }
  0x8c   :  { %v1415_v30 = vld [vmem:[#allocation8 + $0x18] sm:$0xff]   ;;  %v1417_v32 = vld [vmem:[#allocation8 + $0x20] sm:$0xff]   ;;  %v1419_v34 = vld [vmem:[#allocation8 + $0x28] sm:$0xff]  }
  0x8d   :  { %1235 = vmatpush3.bf16.msra.mxu0 %v1396_v5  ;;  %1255 = vmatpush3.bf16.msra.mxu1 %v1397_v6  ;;  %v1420_v35 = vld [vmem:[#allocation8 + $0x30] sm:$0xff]   ;;  %v1422_v37 = vld [vmem:[#allocation8 + $0x38] sm:$0xff]   ;;  %v1424_v43 = vld [vmem:[#allocation10] sm:$0xff]  }
  0x8e   :  { %1236 = vmatprep.subr.bf16.mxu0 %v1692_v0  ;;  %1256 = vmatprep.subr.bf16.mxu1 %v1692_v0  ;;  %v1421_v36 = vld [vmem:[#allocation8 + $0x30] sm:$0xff]   ;;  %v1423_v39 = vld [vmem:[#allocation8 + $0x38] sm:$0xff]   ;;  %v1425_v44 = vld [vmem:[#allocation10] sm:$0xff]  }
  0x8f   :  { %v387_v38 = vld [vmem:[#allocation7] sm:$0xff]  ;;  %v509_v40 = vld [vmem:[#allocation7 + $0x8] sm:$0xff]  ;;  %v1426_v45 = vld [vmem:[#allocation10 + $0x8] sm:$0xff]  }
  0x90   :  { %v388_v41 = vpack.c.bf16 %v387_v38, %v387_v38  ;;  %v510_v42 = vpack.c.bf16 %v509_v40, %v509_v40  ;;  %v1427_v46 = vld [vmem:[#allocation10 + $0x8] sm:$0xff]   ;;  %v1428_v47 = vld [vmem:[#allocation10 + $0x10] sm:$0xff]   ;;  %v1430_v49 = vld [vmem:[#allocation10 + $0x18] sm:$0xff]  }
  0x91   :  { %1237 = vmatpush3.bf16.msra.mxu0 %v1398_v7  ;;  %1257 = vmatpush3.bf16.msra.mxu1 %v1399_v8  ;;  %v1429_v48 = vld [vmem:[#allocation10 + $0x10] sm:$0xff]   ;;  %v1431_v50 = vld [vmem:[#allocation10 + $0x18] sm:$0xff]   ;;  %v1432_v51 = vld [vmem:[#allocation10 + $0x20] sm:$0xff]  }
  0x92   :  { %1238 = vmatprep.subr.bf16.mxu0 %v1692_v0  ;;  %1258 = vmatprep.subr.bf16.mxu1 %v1692_v0  ;;  %v1433_v52 = vld [vmem:[#allocation10 + $0x20] sm:$0xff]   ;;  %v1434_v53 = vld [vmem:[#allocation10 + $0x28] sm:$0xff]   ;;  %v1436_v55 = vld [vmem:[#allocation10 + $0x30] sm:$0xff]  }
  0x93   :  { %v1435_v54 = vld [vmem:[#allocation10 + $0x28] sm:$0xff]   ;;  %v1437_v56 = vld [vmem:[#allocation10 + $0x30] sm:$0xff]   ;;  %v1438_v57 = vld [vmem:[#allocation10 + $0x38] sm:$0xff]  }
  0x94   :  { %v621_v58 = vld [vmem:[%s2081_s8] sm:$0xf]  ;;  %v1439_v59 = vld [vmem:[#allocation10 + $0x38] sm:$0xff]   ;;  %v1144_v60 = vld [vmem:[%s2081_s8 + $0x4] sm:$0xf]  ;;  %s2107_s8 = sld [smem:[#allocation28_spill]] }
  0x95   :  { %1239 = vmatpush3.bf16.msra.mxu0 %v1400_v9  ;;  %1259 = vmatpush3.bf16.msra.mxu1 %v1401_v10  ;;  %v622_v61 = vpack.c.bf16 %v621_v58, %v621_v58  ;;  %v744_v62 = vpack.c.bf16 %v1144_v60, %v1144_v60  ;;  %v1440_v63 = vld [vmem:[%s2086_s13] sm:$0xff]   ;;  %v1442_v2 = vld [vmem:[%s2086_s13 + $0x8] sm:$0xff]   ;;  %v1444_v4 = vld [vmem:[%s2086_s13 + $0x10] sm:$0xff]  }
  0x96   :  { %1240 = vmatprep.subr.bf16.mxu0 %v1692_v0  ;;  %1260 = vmatprep.subr.bf16.mxu1 %v1692_v0  ;;  %v1441_v1 = vld [vmem:[%s2086_s13] sm:$0xff]   ;;  %v1443_v3 = vld [vmem:[%s2086_s13 + $0x8] sm:$0xff]   ;;  %v1445_v5 = vld [vmem:[%s2086_s13 + $0x10] sm:$0xff]  }
  0x97   :  { %v1446_v6 = vld [vmem:[%s2086_s13 + $0x18] sm:$0xff]   ;;  %v855_v7 = vld [vmem:[%s2085_s12] sm:$0x3]  ;;  %v1160_v9 = vld [vmem:[%s2085_s12 + $0x2] sm:$0x3]  ;;  %s1694_s12 = smov [#allocation13]  }
  0x98   :  { %v1447_v8 = vld [vmem:[%s2086_s13 + $0x18] sm:$0xff]   ;;  %v856_v10 = vpack.c.bf16 %v855_v7, %v855_v7  ;;  %s2108_s13 = sld [smem:[#allocation29_spill]]  ;;  %s1036_s1 = sshll.u32 %s1694_s12, 4  ;;  %s1037_s1 = int_to_ptr.vmem [resolvable:$true] %s1036_s1 }
  0x99   :  { %1241 = vmatpush3.bf16.msra.mxu0 %v1402_v11  ;;  %1261 = vmatpush3.bf16.msra.mxu1 %v1403_v12  ;;  %v951_v11 = vpack.c.bf16 %v1160_v9, %v1160_v9  ;;  %s1580_s29 = scalar_lea.vmem %s1037_s1, 512  ;;  %p1585_p7 = scmp.lt.s32.totalorder %s1037_s1, %s1037_s1 }
  0x9a   :  { %1242 = vmatprep.subr.bf16.mxu0 %v1692_v0  ;;  %1262 = vmatprep.subr.bf16.mxu1 %v1692_v0  ;;  %v1106_v12 = vld [vmem:[%s2107_s8] ss:$0 sm:$0xff]  ;;  %p1581_p6 = scmp.ne.s32.totalorder %s1037_s1, %s1580_s29  ;;  %p1586_p8 = scmp.lt.s32.totalorder %s1580_s29, %s1580_s29 }
  0x9c   :  { %p1587_p9 = por %p1586_p8, %p1585_p7 }
  0x9d   :  { %1243 = vmatpush3.bf16.msra.mxu0 %v1404_v13  ;;  %1263 = vmatpush3.bf16.msra.mxu1 %v1405_v14 }
  0x9e   :  { %1244 = vmatprep.subr.bf16.mxu0 %v1692_v0  ;;  %1264 = vmatprep.subr.bf16.mxu1 %v1692_v0  ;;  %v1107_v13 = vld [vmem:[%s2108_s13] ss:$0 sm:$0xff]  ;;  %p1588_p10 = pnand %p1587_p9, %p1581_p6 }
  0xa1   :  { %1245 = vmatpush3.bf16.msra.mxu0 %v1406_v15  ;;  %1265 = vmatpush3.bf16.msra.mxu1 %v1407_v17 }
  0xa2   :  { %1270 = vmatprep.subr.bf16.mxu0 %v1692_v0  ;;  %1290 = vmatprep.subr.bf16.mxu1 %v1692_v0 }
  0xa4   :  { %1247 = vmatmul.mubr.bf16.vlgmr.msra.gmra.mrb[0].mxu0 %v145_v21  ;;  %1267 = vmatmul.mubr.bf16.vlgmr.msra.gmra.mrb[0].mxu1 %v272_v22 }
  0xa5   :  { %1271 = vmatpush3.bf16.msra.mxu0 %v1408_v23  ;;  %1291 = vmatpush3.bf16.msra.mxu1 %v1409_v24 }
  0xa6   :  { %1272 = vmatprep.subr.bf16.mxu0 %v1692_v0  ;;  %1292 = vmatprep.subr.bf16.mxu1 %v1692_v0 }
  0xa7   :  { %1286 = vmatprep.mubr.msk.bf16.mxu0 %vm1693_vm0, %v1692_v0  ;;  %1306 = vmatprep.mubr.msk.bf16.mxu1 %vm1693_vm0, %v1692_v0 }
  0xa9   :  { %1273 = vmatpush3.bf16.msra.mxu0 %v1410_v25  ;;  %1293 = vmatpush3.bf16.msra.mxu1 %v1411_v26 }
  0xaa   :  { %1274 = vmatprep.subr.bf16.mxu0 %v1692_v0  ;;  %1294 = vmatprep.subr.bf16.mxu1 %v1692_v0 }
  0xad   :  { %1275 = vmatpush3.bf16.msra.mxu0 %v1412_v27  ;;  %1295 = vmatpush3.bf16.msra.mxu1 %v1413_v28 }
  0xae   :  { %1276 = vmatprep.subr.bf16.mxu0 %v1692_v0  ;;  %1296 = vmatprep.subr.bf16.mxu1 %v1692_v0 }
  0xb1   :  { %1277 = vmatpush3.bf16.msra.mxu0 %v1414_v29  ;;  %1297 = vmatpush3.bf16.msra.mxu1 %v1415_v30 }
  0xb2   :  { %1278 = vmatprep.subr.bf16.mxu0 %v1692_v0  ;;  %1298 = vmatprep.subr.bf16.mxu1 %v1692_v0 }
  0xb5   :  { %1279 = vmatpush3.bf16.msra.mxu0 %v1416_v31  ;;  %1299 = vmatpush3.bf16.msra.mxu1 %v1417_v32 }
  0xb6   :  { %1280 = vmatprep.subr.bf16.mxu0 %v1692_v0  ;;  %1300 = vmatprep.subr.bf16.mxu1 %v1692_v0 }
  0xb9   :  { %1281 = vmatpush3.bf16.msra.mxu0 %v1418_v33  ;;  %1301 = vmatpush3.bf16.msra.mxu1 %v1419_v34 }
  0xba   :  { %1282 = vmatprep.subr.bf16.mxu0 %v1692_v0  ;;  %1302 = vmatprep.subr.bf16.mxu1 %v1692_v0 }
  0xbd   :  { %1283 = vmatpush3.bf16.msra.mxu0 %v1420_v35  ;;  %1303 = vmatpush3.bf16.msra.mxu1 %v1421_v36 }
  0xbe   :  { %1284 = vmatprep.subr.bf16.mxu0 %v1692_v0  ;;  %1304 = vmatprep.subr.bf16.mxu1 %v1692_v0 }
  0xc1   :  { %1285 = vmatpush3.bf16.msra.mxu0 %v1422_v37  ;;  %1305 = vmatpush3.bf16.msra.mxu1 %v1423_v39 }
  0xc2   :  { %1310 = vmatprep.subr.bf16.mxu0 %v1692_v0  ;;  %1330 = vmatprep.subr.bf16.mxu1 %v1692_v0 }
  0xc4   :  { %1287 = vmatmul.mubr.bf16.vlgmr.msra.gmra.mrb[4].mxu0 %v388_v41  ;;  %1307 = vmatmul.mubr.bf16.vlgmr.msra.gmra.mrb[4].mxu1 %v510_v42 }
  0xc5   :  { %1311 = vmatpush3.bf16.msra.mxu0 %v1424_v43  ;;  %1331 = vmatpush3.bf16.msra.mxu1 %v1425_v44 }
  0xc6   :  { %1312 = vmatprep.subr.bf16.mxu0 %v1692_v0  ;;  %1332 = vmatprep.subr.bf16.mxu1 %v1692_v0 }
  0xc7   :  { %1326 = vmatprep.mubr.msk.bf16.mxu0 %vm1693_vm0, %v1692_v0  ;;  %1346 = vmatprep.mubr.msk.bf16.mxu1 %vm1693_vm0, %v1692_v0 }
  0xc9   :  { %1313 = vmatpush3.bf16.msra.mxu0 %v1426_v45  ;;  %1333 = vmatpush3.bf16.msra.mxu1 %v1427_v46 }
  0xca   :  { %1314 = vmatprep.subr.bf16.mxu0 %v1692_v0  ;;  %1334 = vmatprep.subr.bf16.mxu1 %v1692_v0 }
  0xcd   :  { %1315 = vmatpush3.bf16.msra.mxu0 %v1428_v47  ;;  %1335 = vmatpush3.bf16.msra.mxu1 %v1429_v48 }
  0xce   :  { %1316 = vmatprep.subr.bf16.mxu0 %v1692_v0  ;;  %1336 = vmatprep.subr.bf16.mxu1 %v1692_v0 }
  0xd1   :  { %1317 = vmatpush3.bf16.msra.mxu0 %v1430_v49  ;;  %1337 = vmatpush3.bf16.msra.mxu1 %v1431_v50 }
  0xd2   :  { %1318 = vmatprep.subr.bf16.mxu0 %v1692_v0  ;;  %1338 = vmatprep.subr.bf16.mxu1 %v1692_v0 }
  0xd5   :  { %1319 = vmatpush3.bf16.msra.mxu0 %v1432_v51  ;;  %1339 = vmatpush3.bf16.msra.mxu1 %v1433_v52 }
  0xd6   :  { %1320 = vmatprep.subr.bf16.mxu0 %v1692_v0  ;;  %1340 = vmatprep.subr.bf16.mxu1 %v1692_v0 }
  0xd9   :  { %1321 = vmatpush3.bf16.msra.mxu0 %v1434_v53  ;;  %1341 = vmatpush3.bf16.msra.mxu1 %v1435_v54 }
  0xda   :  { %1322 = vmatprep.subr.bf16.mxu0 %v1692_v0  ;;  %1342 = vmatprep.subr.bf16.mxu1 %v1692_v0 }
  0xdd   :  { %1323 = vmatpush3.bf16.msra.mxu0 %v1436_v55  ;;  %1343 = vmatpush3.bf16.msra.mxu1 %v1437_v56 }
  0xde   :  { %1324 = vmatprep.subr.bf16.mxu0 %v1692_v0  ;;  %1344 = vmatprep.subr.bf16.mxu1 %v1692_v0 }
  0xe1   :  { %1325 = vmatpush3.bf16.msra.mxu0 %v1438_v57  ;;  %1345 = vmatpush3.bf16.msra.mxu1 %v1439_v59 }
  0xe2   :  { %1350 = vmatprep.subr.bf16.mxu0 %v1692_v0  ;;  %1362 = vmatprep.subr.bf16.mxu1 %v1692_v0 }
  0xe4   :  { %1327 = vmatmul.mubr.bf16.vlgmr.msra.gmra.mrb[8].mxu0 %v622_v61  ;;  %1347 = vmatmul.mubr.bf16.vlgmr.msra.gmra.mrb[8].mxu1 %v744_v62 }
  0xe5   :  { %1351 = vmatpush3.bf16.msra.mxu0 %v1440_v63  ;;  %1363 = vmatpush3.bf16.msra.mxu1 %v1441_v1 }
  0xe6   :  { %1352 = vmatprep.subr.bf16.mxu0 %v1692_v0  ;;  %1364 = vmatprep.subr.bf16.mxu1 %v1692_v0 }
  0xe7   :  { %1358 = vmatprep.mubr.msk.bf16.mxu0 %vm1693_vm0, %v1692_v0  ;;  %1370 = vmatprep.mubr.msk.bf16.mxu1 %vm1693_vm0, %v1692_v0 }
  0xe9   :  { %1353 = vmatpush3.bf16.msra.mxu0 %v1442_v2  ;;  %1365 = vmatpush3.bf16.msra.mxu1 %v1443_v3 }
  0xea   :  { %1354 = vmatprep.subr.bf16.mxu0 %v1692_v0  ;;  %1366 = vmatprep.subr.bf16.mxu1 %v1692_v0 }
  0xed   :  { %1355 = vmatpush3.bf16.msra.mxu0 %v1444_v4  ;;  %1367 = vmatpush3.bf16.msra.mxu1 %v1445_v5 }
  0xee   :  { %1356 = vmatprep.subr.bf16.mxu0 %v1692_v0  ;;  %1368 = vmatprep.subr.bf16.mxu1 %v1692_v0 }
  0xf1   :  { %1357 = vmatpush3.bf16.msra.mxu0 %v1446_v6  ;;  %1369 = vmatpush3.bf16.msra.mxu1 %v1447_v8 }
  0xf4   :  { %1359 = vmatmul.mubr.msk.bf16.vlgmr.msra.gmra.mrb[12].mxu0 %vm889_vm1, %v856_v10  ;;  %1371 = vmatmul.mubr.msk.bf16.vlgmr.msra.gmra.mrb[12].mxu1 %vm889_vm1, %v951_v11 }
 0x177   :  { %v244_v14 = vpop.f32.mrb[0].mxu0  ;;  %v371_v16 = vpop.f32.mrb[0].mxu1 }
 0x178   :  { %v257_v15 = vmul.f32 %v1106_v12, %v244_v14  ;;  %v1248_v17 = vpop.f32.mrb[1].mxu0  ;;  %v378_v0 = vmul.f32 %v1106_v12, %v371_v16  ;;  %v1268_v18 = vpop.f32.mrb[1].mxu1 }
 0x179   :  { %v247_v19 = vpop.f32.mrb[2].mxu0  ;;  %v374_v22 = vpop.f32.mrb[2].mxu1 }
 0x17a   :  { %v265_v20 = vadd.f32 %v1107_v13, %v257_v15  ;;  %v258_v21 = vmul.f32 %v1106_v12, %v247_v19  ;;  %v1249_v23 = vpop.f32.mrb[3].mxu0  ;;  %v380_v24 = vadd.f32 %v1107_v13, %v378_v0  ;;  %v379_v25 = vmul.f32 %v1106_v12, %v374_v22  ;;  %v1269_v26 = vpop.f32.mrb[3].mxu1 }
 0x17c   :  { %267 = vst [vmem:[#allocation13] sm:$0xff] %v265_v20  ;;  %v266_v27 = vadd.f32 %v1107_v13, %v258_v21  ;;  %383 = vst [vmem:[#allocation13 + $0x10] sm:$0xff] %v380_v24  ;;  %v381_v28 = vadd.f32 %v1107_v13, %v379_v25 }
 0x17e   :  { %268 = vst [vmem:[#allocation13 + $0x8] sm:$0xff] %v266_v27  ;;  %384 = vst [vmem:[#allocation13 + $0x18] sm:$0xff] %v381_v28 }
 0x17f   :  { %1591 = shalt.err (!%p1588_p10)
}
 0x180   :  { %s1592_s9 = scalar_lea.hbm %s2089_s16, 512 }
 0x181   :  { %p1593_p11 = scmp.ne.s32.totalorder %s2089_s16, %s1592_s9  ;;  %p1596_p12 = scmp.lt.u32.totalorder %s1592_s9, %s2089_s16 }
 0x183   :  { %p1598_p13 = pnand %p1596_p12, %p1593_p11 }
 0x185   :  { %1601 = shalt.err (!%p1598_p13)
}
 0x186   :  { %1042 = dma.vmem_to_hbm [thread:$0]  %s1037_s1, 512, %s2089_s16, [#allocation4], %s1687_s5, %s1687_s5, %s1688_s20  }
 0x187   :  { %v1124_v29 = vld [vmem:[%s2079_s6] ss:$0 sm:$0xff]  ;;  %s1695_s8 = smov [#allocation14]  }
 0x188   :  { %v1125_v30 = vld [vmem:[%s2080_s7] ss:$0 sm:$0xff]  ;;  %s1048_s30 = sshll.u32 %s1695_s8, 4  ;;  %s1049_s30 = int_to_ptr.vmem [resolvable:$true] %s1048_s30 }
 0x189   :  { %s1602_s6 = scalar_lea.vmem %s1049_s30, 256  ;;  %p1607_p1 = scmp.lt.s32.totalorder %s1049_s30, %s1049_s30 }
 0x18a   :  { %p1603_p0 = scmp.ne.s32.totalorder %s1049_s30, %s1602_s6  ;;  %p1608_p2 = scmp.lt.s32.totalorder %s1602_s6, %s1602_s6 }
 0x18c   :  { %p1609_p3 = por %p1608_p2, %p1607_p1 }
 0x18e   :  { %p1610_p4 = pnand %p1609_p3, %p1603_p0 }
 0x197   :  { %v487_v31 = vpop.f32.mrb[4].mxu0  ;;  %v609_v33 = vpop.f32.mrb[4].mxu1 }
 0x198   :  { %v499_v32 = vmul.f32 %v1124_v29, %v487_v31  ;;  %v1288_v34 = vpop.f32.mrb[5].mxu0  ;;  %v615_v35 = vmul.f32 %v1124_v29, %v609_v33  ;;  %v1308_v36 = vpop.f32.mrb[5].mxu1 }
 0x199   :  { %v490_v37 = vpop.f32.mrb[6].mxu0  ;;  %v612_v39 = vpop.f32.mrb[6].mxu1 }
 0x19a   :  { %v506_v38 = vadd.f32 %v1125_v30, %v499_v32  ;;  %v1289_v40 = vpop.f32.mrb[7].mxu0  ;;  %v616_v41 = vadd.f32 %v1125_v30, %v615_v35  ;;  %v1309_v42 = vpop.f32.mrb[7].mxu1 }
 0x19c   :  { %507 = vst [vmem:[#allocation14] sm:$0xff] %v506_v38  ;;  %618 = vst [vmem:[#allocation14 + $0x8] sm:$0xff] %v616_v41 }
 0x19d   :  { %1613 = shalt.err (!%p1610_p4)
}
 0x19e   :  { %s1614_s26 = scalar_lea.hbm %s2090_s17, 256 }
 0x19f   :  { %p1615_p5 = scmp.ne.s32.totalorder %s2090_s17, %s1614_s26  ;;  %p1618_p6 = scmp.lt.u32.totalorder %s1614_s26, %s2090_s17 }
 0x1a1   :  { %p1620_p7 = pnand %p1618_p6, %p1615_p5 }
 0x1a3   :  { %1623 = shalt.err (!%p1620_p7)
}
 0x1a4   :  { %1054 = dma.vmem_to_hbm [thread:$0]  %s1049_s30, 256, %s2090_s17, [#allocation15], %s1687_s5, %s1687_s5, %s1688_s20   ;;  %v1143_v44 = vld [vmem:[#allocation11] ss:$0 sm:$0xff] }
 0x1a5   :  { %v1142_v43 = vld [vmem:[%s2083_s10] ss:$0 sm:$0xff]  ;;  %s1696_s2 = smov [#allocation16]  }
 0x1a6   :  { %s1060_s11 = sshll.u32 %s1696_s2, 4  ;;  %s1061_s11 = int_to_ptr.vmem [resolvable:$true] %s1060_s11 }
 0x1a7   :  { %s1624_s17 = scalar_lea.vmem %s1061_s11, 128  ;;  %p1629_p9 = scmp.lt.s32.totalorder %s1061_s11, %s1061_s11 }
 0x1a8   :  { %p1625_p8 = scmp.ne.s32.totalorder %s1061_s11, %s1624_s17  ;;  %p1630_p10 = scmp.lt.s32.totalorder %s1624_s17, %s1624_s17 }
 0x1aa   :  { %p1631_p11 = por %p1630_p10, %p1629_p9 }
 0x1ac   :  { %p1632_p12 = pnand %p1631_p11, %p1625_p8 }
 0x1b7   :  { %v721_v45 = vpop.f32.mrb[8].mxu0  ;;  %v843_v47 = vpop.f32.mrb[8].mxu1 }
 0x1b8   :  { %v733_v46 = vmul.f32 %v1142_v43, %v721_v45  ;;  %v1328_v48 = vpop.f32.mrb[9].mxu0  ;;  %v849_v49 = vmul.f32 %v1142_v43, %v843_v47  ;;  %v1348_v50 = vpop.f32.mrb[9].mxu1 }
 0x1b9   :  { %v724_v51 = vpop.f32.mrb[10].mxu0  ;;  %v846_v53 = vpop.f32.mrb[10].mxu1 }
 0x1ba   :  { %v740_v52 = vadd.f32 %v1143_v44, %v733_v46  ;;  %v1329_v54 = vpop.f32.mrb[11].mxu0  ;;  %v850_v55 = vadd.f32 %v1143_v44, %v849_v49  ;;  %v1349_v56 = vpop.f32.mrb[11].mxu1 }
 0x1bc   :  { %741 = vst [vmem:[#allocation16] sm:$0xf] %v740_v52  ;;  %852 = vst [vmem:[#allocation16 + $0x4] sm:$0xf] %v850_v55 }
 0x1bd   :  { %1635 = shalt.err (!%p1632_p12)
}
 0x1be   :  { %s1636_s20 = scalar_lea.hbm %s2091_s18, 128 }
 0x1bf   :  { %p1637_p13 = scmp.ne.s32.totalorder %s2091_s18, %s1636_s20  ;;  %p1640_p0 = scmp.lt.u32.totalorder %s1636_s20, %s2091_s18 }
 0x1c1   :  { %p1642_p1 = pnand %p1640_p0, %p1637_p13 }
 0x1c3   :  { %1645 = shalt.err (!%p1642_p1)
}
 0x1c4   :  { %1066 = dma.vmem_to_hbm [thread:$0]  %s1061_s11, 128, %s2091_s18, [#allocation15], %s2106_s4, %s2106_s4, %s1684_s27   ;;  %vm947_vm2 = vcmask 517120  }
 0x1c5   :  { %v1158_v57 = vld [vmem:[%s2087_s14] ss:$0 sm:$0xff]  ;;  %s2109_s7 = sld [smem:[#allocation30_spill]]  ;;  %s1697_s16 = smov [#allocation17]  }
 0x1c6   :  { %s1072_s26 = sshll.u32 %s1697_s16, 4  ;;  %s1073_s26 = int_to_ptr.vmem [resolvable:$true] %s1072_s26 }
 0x1c7   :  { %v927_v59 = vpop.f32.mrb[12].mxu0  ;;  %v1021_v61 = vpop.f32.mrb[12].mxu1  ;;  %s1646_s14 = scalar_lea.vmem %s1073_s26, 64  ;;  %p1651_p3 = scmp.lt.s32.totalorder %s1073_s26, %s1073_s26 }
 0x1c8   :  { %v939_v60 = vmul.f32 %v1158_v57, %v927_v59  ;;  %v1360_v62 = vpop.f32.mrb[13].mxu0  ;;  %v1027_v63 = vmul.f32 %v1158_v57, %v1021_v61  ;;  %v1372_v1 = vpop.f32.mrb[13].mxu1  ;;  %p1647_p2 = scmp.ne.s32.totalorder %s1073_s26, %s1646_s14  ;;  %p1652_p4 = scmp.lt.s32.totalorder %s1646_s14, %s1646_s14 }
 0x1c9   :  { %v930_v2 = vpop.f32.mrb[14].mxu0  ;;  %v1024_v4 = vpop.f32.mrb[14].mxu1 }
 0x1ca   :  { %v1361_v5 = vpop.f32.mrb[15].mxu0  ;;  %v1373_v7 = vpop.f32.mrb[15].mxu1  ;;  %p1653_p5 = por %p1652_p4, %p1651_p3 }
 0x1cb   :  { %v1159_v58 = vld [vmem:[%s2109_s7] ss:$0 sm:$0xff] }
 0x1cc   :  { %v946_v3 = vadd.f32 %v1159_v58, %v939_v60  ;;  %v1028_v6 = vadd.f32 %v1159_v58, %v1027_v63  ;;  %p1654_p6 = pnand %p1653_p5, %p1647_p2 }
 0x1ce   :  { %948 = vst.msk [vmem:[#allocation17] sm:$0x3] %vm947_vm2, %v946_v3  ;;  %1030 = vst.msk [vmem:[#allocation17 + $0x2] sm:$0x3] %vm947_vm2, %v1028_v6 }
 0x1cf   :  { %1657 = shalt.err (!%p1654_p6)
}
 0x1d0   :  { %s2110_s4 = sld [smem:[#allocation31_spill]] }
 0x1d6   :  { %s1658_s13 = scalar_lea.hbm %s2110_s4, 64 }
 0x1d7   :  { %p1659_p7 = scmp.ne.s32.totalorder %s2110_s4, %s1658_s13  ;;  %p1662_p8 = scmp.lt.u32.totalorder %s1658_s13, %s2110_s4 }
 0x1d9   :  { %p1664_p9 = pnand %p1662_p8, %p1659_p7 }
 0x1db   :  { %1667 = shalt.err (!%p1664_p9)
}
 0x1dc   :  { %s1698_s21 = smov 32   ;;  %s1699_s9 = smov 2  }
 0x1dd   :  { %1078 = dma.vmem_to_hbm [thread:$0]  %s1073_s26, 64, %s2110_s4, [#allocation18], %s1698_s21, %s1698_s21, %s1699_s9  }
 0x1de   :  { %1676 = dma.done.wait [#allocation4], 512  }
 0x1df   :  { %1677 = vsyncadd [#allocation4], 4294966784 }
 0x1e0   :  { %1678 = dma.done.wait [#allocation15], 384  }
 0x1e1   :  { %1679 = vsyncadd [#allocation15], 4294966912 }
 0x1e2   :  { %1680 = dma.done.wait [#allocation18], 64  }
 0x1e3   :  { %1681 = vsyncadd [#allocation18], 4294967232 }
 0x1e4   :  { %1091 = vsyncpa [#allocation3], 1 }
 0x1e5   :  { %1092 = vsyncpa [#allocation6], 1 }
 0x1e6   :  { %1093 = vsyncpa [#allocation9], 1 }
 0x1e7   :  { %1094 = vsyncpa [#allocation12], 1 }
 0x1e8   :  { %1095 = vsyncpa [#allocation4], 1 }
 0x1e9   :  { %1096 = vsyncpa [#allocation15], 1 }
 0x1ea   :  { %1097 = vsyncpa [#allocation18], 1 }

</bundles_post_ra>
